<compile_context>
chip_gen: v6e
topology: v6e:2x2x1
jax: 0.10.0
libtpu: 0.0.40
codegen_flags: <defaults>
</compile_context>

<pallas_src>
import functools
import math

import jax
import jax.numpy as jnp
import numpy as np
from jax import lax
from jax.experimental import pallas as pl
from jax.experimental.pallas import tpu as pltpu

NEG_BIG = -1e12   # finite mask bias (matches min-dalle); avoids -inf -> NaN


def _pick_chunk(total, preferred, align):
    """Largest chunk <= preferred that divides `total` and is a multiple of
    `align`; falls back to `total` (i.e. no chunking)."""
    c = (min(preferred, total) // align) * align
    while c >= align:
        if total % c == 0:
            return c
        c -= align
    return total


# ---------------------------------------------------------------------------
# in-kernel helpers (operate on arrays, not refs) -- all math in f32
# ---------------------------------------------------------------------------
def _layernorm(x, w, b, eps=1e-5):
    mu = jnp.mean(x, axis=-1, keepdims=True)
    var = jnp.mean(jnp.square(x - mu), axis=-1, keepdims=True)
    return (x - mu) * lax.rsqrt(var + eps) * w + b


def _mha_decode(q, keys, vals, mask, head_count):
    """Single-query multi-head attention; per-head contraction over D (VPU).

    q: (B, E) f32, keys/vals: (B, K, E), mask: (B or 1, K) bool -> (B, E) f32.
    No one-hot matmul trick: FLOPs are exactly 2*B*K*E (no H-fold inflation).
    """
    B, E = q.shape
    K = keys.shape[1]
    H = head_count
    D = E // H
    scale = 1.0 / math.sqrt(D)
    q4 = (q * scale).reshape(B, 1, H, D)
    k4 = keys.astype(jnp.float32).reshape(B, K, H, D)
    v4 = vals.astype(jnp.float32).reshape(B, K, H, D)
    m4 = mask[:, :, None, None]                                    # (B|1,K,1,1)
    s = jnp.sum(q4 * k4, axis=-1, keepdims=True)                   # (B,K,H,1)
    s = jnp.where(m4, s, NEG_BIG)
    p = jnp.exp(s - jnp.max(s, axis=1, keepdims=True))
    p = p / jnp.sum(p, axis=1, keepdims=True)                      # exact norm
    v4 = jnp.where(m4, v4, 0.0)        # guard against stale/garbage tail rows
    o = jnp.sum(p * v4, axis=1)                                    # (B,H,D)
    return o.reshape(B, E)


# ---------------------------------------------------------------------------
# kernel 1: encoder K/V projection (computed once per prompt, not per token)
# ---------------------------------------------------------------------------
def cross_kv_kernel(enc_ref, kw_ref, vw_ref, kout_ref, vout_ref):
    B, Tb, E = enc_ref.shape
    tn = kw_ref.shape[1]
    enc2d = enc_ref[...].reshape(B * Tb, E)
    k = jnp.dot(enc2d, kw_ref[...], preferred_element_type=jnp.float32)
    v = jnp.dot(enc2d, vw_ref[...], preferred_element_type=jnp.float32)
    kout_ref[...] = k.reshape(B, Tb, tn).astype(kout_ref.dtype)
    vout_ref[...] = v.reshape(B, Tb, tn).astype(vout_ref.dtype)


def precompute_cross_kv(encoder_state, k_w, v_w, *, out_dtype=jnp.bfloat16,
                        t_block=None, n_block=None):
    """Encoder K/V projections (depend only on encoder_state: amortised over
    all decode steps).  Tiled over (seq, N) with both axes 'parallel'."""
    B, T, E = encoder_state.shape
    if t_block is None:
        t_block = _pick_chunk(T, max(8, 256 // max(B, 1)),
                              8 if T % 8 == 0 else 1)
    if n_block is None:
        n_block = _pick_chunk(E, 256, 128)
    enc_spec = pl.BlockSpec((B, t_block, E), lambda t, n: (0, t, 0))
    w_spec = pl.BlockSpec((E, n_block), lambda t, n: (0, n))
    out_spec = pl.BlockSpec((B, t_block, n_block), lambda t, n: (0, t, n))
    return pl.pallas_call(
        cross_kv_kernel,
        out_shape=(jax.ShapeDtypeStruct((B, T, E), out_dtype),
                   jax.ShapeDtypeStruct((B, T, E), out_dtype)),
        grid=(T // t_block, E // n_block),
        in_specs=[enc_spec, w_spec, w_spec],
        out_specs=(out_spec, out_spec),
        compiler_params=pltpu.CompilerParams(
            dimension_semantics=("parallel", "parallel")),
    )(encoder_state, k_w, v_w)


# ---------------------------------------------------------------------------
# kernel 2: the decoder layer (single-token decode step)
# ---------------------------------------------------------------------------
def decoder_layer_kernel(
    # inputs
    tok_ref,          # SMEM (1,) int32 : token_index
    dec_ref,          # VMEM (B, E) f32
    kenc_ref,         # VMEM (B, T, E) bf16 : pre-projected encoder keys
    venc_ref,         # VMEM (B, T, E) bf16 : pre-projected encoder values
    xmask_ref,        # VMEM (B, T) f32 (1.0 = attend)
    astate_hbm,       # ANY  (2B, I, E) bf16 : KV cache (aliased with output 1)
    ln_w_ref,         # VMEM (5, E) f32 : [pre_self, self, pre_enc, enc, glu_ln0]
    ln_b_ref,         # VMEM (5, E) f32
    glu_ln1_ref,      # VMEM (2, G) f32 : [weight, bias] of GLU ln1
    self_w_ref,       # VMEM (4, E, E) bf16 : [k, v, q, out]   (in, out) layout
    cross_qo_ref,     # VMEM (2, E, E) bf16 : [q, out]
    fc0_hbm,          # ANY  (E, G) bf16  (streamed)
    fc1_hbm,          # ANY  (E, G) bf16  (streamed)
    fc2_hbm,          # ANY  (G, E) bf16  (streamed)
    # outputs
    dec_out_ref,      # VMEM (B, E) f32
    astate_out_hbm,   # ANY  (2B, I, E) bf16, aliased with astate_hbm
    # scratch
    cache_ref,        # VMEM (2B, I, E) bf16
    inter_ref,        # VMEM (B, G) f32  : GLU gate*value intermediate
    w01_buf,          # VMEM (2, 2, E, GT) bf16 : fc0/fc1 double buffer
    w2_buf,           # VMEM (2, GT, E) bf16    : fc2 double buffer
    csem,             # DMA sems (NCH,)  : cache chunk reads
    wsem,             # DMA sems (1,)    : single-row cache writeback
    gsem,             # DMA sems (2, 3)  : GLU weight streaming (slot, which)
    *,
    head_count: int,
    cache_chunk: int,
    glu_chunk: int,
):
    B, E = dec_ref.shape
    I = cache_ref.shape[1]
    G = inter_ref.shape[1]
    IC, GT = cache_chunk, glu_chunk
    NCH, NG = I // IC, G // GT
    tok = tok_ref[0]

    def mm(x, w):  # bf16 operands, f32 accumulation on the MXU
        return jnp.dot(x.astype(w.dtype), w, preferred_element_type=jnp.float32)

    # ---- KV-cache prefix read: only chunks covering rows [0, tok] ----------
    # Skipped chunks are zero-filled so stale VMEM can never poison softmax.
    def cache_cp(c):
        return pltpu.make_async_copy(
            astate_hbm.at[:, pl.ds(c * IC, IC), :],
            cache_ref.at[:, pl.ds(c * IC, IC), :], csem.at[c])

    for c in range(NCH):
        @pl.when(c * IC <= tok)
        def _(c=c):
            cache_cp(c).start()

        @pl.when(c * IC > tok)
        def _(c=c):
            cache_ref[:, pl.ds(c * IC, IC), :] = jnp.zeros(
                (2 * B, IC, E), cache_ref.dtype)

    # ---- GLU weight streaming (manual double-buffer, weights stay in HBM) --
    def w01_cp(g, slot):
        return (pltpu.make_async_copy(fc0_hbm.at[:, pl.ds(g * GT, GT)],
                                      w01_buf.at[slot, 0], gsem.at[slot, 0]),
                pltpu.make_async_copy(fc1_hbm.at[:, pl.ds(g * GT, GT)],
                                      w01_buf.at[slot, 1], gsem.at[slot, 1]))

    def w2_cp(g, slot):
        return pltpu.make_async_copy(fc2_hbm.at[pl.ds(g * GT, GT), :],
                                     w2_buf.at[slot], gsem.at[slot, 2])

    for cp in w01_cp(0, 0):     # prefetch first GLU chunk behind attention
        cp.start()

    x = dec_ref[...]                                               # (B, E) f32

    # ------------------------------ self attention --------------------------
    residual = x
    h = _layernorm(x, ln_w_ref[0], ln_b_ref[0])
    k_new = mm(h, self_w_ref[0])
    v_new = mm(h, self_w_ref[1])
    q = mm(h, self_w_ref[2])

    for c in range(NCH):        # cache DMAs were overlapped with the matmuls
        @pl.when(c * IC <= tok)
        def _(c=c):
            cache_cp(c).wait()

    # Update ONLY the `tok` row and write back only that row (aliased output).
    cache_ref[pl.ds(0, B), pl.ds(tok, 1), :] = (
        k_new[:, None, :].astype(cache_ref.dtype))
    cache_ref[pl.ds(B, B), pl.ds(tok, 1), :] = (
        v_new[:, None, :].astype(cache_ref.dtype))
    row_out = pltpu.make_async_copy(cache_ref.at[:, pl.ds(tok, 1), :],
                                    astate_out_hbm.at[:, pl.ds(tok, 1), :],
                                    wsem.at[0])
    row_out.start()

    pos = lax.broadcasted_iota(jnp.int32, (1, I), 1)
    o = _mha_decode(q,
                    cache_ref[pl.ds(0, B), :, :],
                    cache_ref[pl.ds(B, B), :, :],
                    pos <= tok, head_count)
    o = mm(o, self_w_ref[3])
    x = residual + _layernorm(o, ln_w_ref[1], ln_b_ref[1])

    # ------------------------------ cross attention --------------------------
    residual = x
    h = _layernorm(x, ln_w_ref[2], ln_b_ref[2])
    q = mm(h, cross_qo_ref[0])
    o = _mha_decode(q, kenc_ref[...], venc_ref[...],
                    xmask_ref[...] > 0.5, head_count)
    o = mm(o, cross_qo_ref[1])
    x = residual + _layernorm(o, ln_w_ref[3], ln_b_ref[3])

    # ------------------------------ GLU (weight streamed) --------------------
    # TODO(synk): on v7x also stream the (E,E) self/cross weights the same way
    # at production E, and shard the G-chunk loop across the 2 TCs (core_map).
    residual = x
    z = _layernorm(x, ln_w_ref[4], ln_b_ref[4])

    w2_cp(0, 0).start()                  # prefetch fc2 chunk 0 during phase 1
    for g in range(NG):                  # phase 1: fc0 / fc1 over G chunks
        slot = g % 2
        for cp in w01_cp(g, slot):
            cp.wait()
        if g + 1 < NG:
            for cp in w01_cp(g + 1, 1 - slot):
                cp.start()
        w0 = mm(z, w01_buf[slot, 0])
        w0 = 0.5 * w0 * (1.0 + lax.erf(w0 * (1.0 / math.sqrt(2.0))))  # exact GELU
        v1 = mm(z, w01_buf[slot, 1])
        inter_ref[:, g * GT:(g + 1) * GT] = w0 * v1

    hglu = _layernorm(inter_ref[...], glu_ln1_ref[0], glu_ln1_ref[1])

    acc = jnp.zeros((B, E), jnp.float32)
    for g in range(NG):                  # phase 2: fc2 over G chunks (reduce)
        slot = g % 2
        w2_cp(g, slot).wait()
        if g + 1 < NG:
            w2_cp(g + 1, 1 - slot).start()
        acc = acc + mm(hglu[:, g * GT:(g + 1) * GT], w2_buf[slot])

    dec_out_ref[...] = residual + acc
    row_out.wait()


# ---------------------------------------------------------------------------
# wrapper
# ---------------------------------------------------------------------------
def decoder_layer_forward(params, decoder_state, encoder_state, attention_state,
                          attention_mask, token_index, head_count, *,
                          wdtype=jnp.bfloat16, cache_chunk=None, glu_chunk=None):
    B, _, E = decoder_state.shape
    I = attention_state.shape[1]
    T = encoder_state.shape[1]
    G = params["glu_fc0"].shape[1]

    if cache_chunk is None:
        cache_chunk = _pick_chunk(I, 64, 8)
    if glu_chunk is None:
        glu_chunk = _pick_chunk(G, 512, 128)
    assert I % cache_chunk == 0 and G % glu_chunk == 0
    n_cache_chunks = I // cache_chunk

    dec2d = decoder_state.reshape(B, E).astype(jnp.float32)
    xmask_f = attention_mask.astype(jnp.float32)
    tok = jnp.asarray(token_index, jnp.int32).reshape(1)
    astate = attention_state.astype(wdtype)

    self_w = params["self_w"].astype(wdtype)
    cross_w = params["cross_w"].astype(wdtype)
    fc0 = params["glu_fc0"].astype(wdtype)
    fc1 = params["glu_fc1"].astype(wdtype)
    fc2 = params["glu_fc2"].astype(wdtype)
    ln_w = params["ln_w"].astype(jnp.float32)
    ln_b = params["ln_b"].astype(jnp.float32)
    glu_ln1 = params["glu_ln1"].astype(jnp.float32)

    # Cross-attention K/V depend only on encoder_state: computed once per
    # prompt and reused for every image-token step.
    k_enc, v_enc = precompute_cross_kv(encoder_state.astype(wdtype),
                                       cross_w[0], cross_w[1], out_dtype=wdtype)

    ws = jnp.dtype(wdtype).itemsize
    vmem_need = (2 * B * I * E * ws                                   # cache
                 + B * G * 4                                          # GLU inter
                 + (4 * E * glu_chunk + 2 * glu_chunk * E) * ws       # stream bufs
                 + 2 * B * T * E * ws                                 # k/v_enc
                 + 6 * E * E * ws                                     # resident W
                 + (2 * B * E + B * T + 7 * E + 2 * G) * 4)           # small stuff
    vmem_limit = int(max(32 << 20, min(96 << 20, 2 * vmem_need + (8 << 20))))

    kernel = functools.partial(decoder_layer_kernel, head_count=head_count,
                               cache_chunk=cache_chunk, glu_chunk=glu_chunk)
    vmem = pl.BlockSpec(memory_space=pltpu.MemorySpace.VMEM)
    smem = pl.BlockSpec(memory_space=pltpu.MemorySpace.SMEM)
    anyspace = pl.BlockSpec(memory_space=pl.ANY)

    dec_out, astate_out = pl.pallas_call(
        kernel,
        out_shape=(jax.ShapeDtypeStruct((B, E), jnp.float32),
                   jax.ShapeDtypeStruct((2 * B, I, E), wdtype)),
        in_specs=[smem, vmem, vmem, vmem, vmem, anyspace,
                  vmem, vmem, vmem, vmem, vmem,
                  anyspace, anyspace, anyspace],
        out_specs=(vmem, anyspace),
        scratch_shapes=[
            pltpu.VMEM((2 * B, I, E), wdtype),          # cache
            pltpu.VMEM((B, G), jnp.float32),            # GLU intermediate
            pltpu.VMEM((2, 2, E, glu_chunk), wdtype),   # fc0/fc1 double buffer
            pltpu.VMEM((2, glu_chunk, E), wdtype),      # fc2 double buffer
            pltpu.SemaphoreType.DMA((n_cache_chunks,)),
            pltpu.SemaphoreType.DMA((1,)),
            pltpu.SemaphoreType.DMA((2, 3)),
        ],
        input_output_aliases={5: 1},   # attention_state updated in place
        compiler_params=pltpu.CompilerParams(
            has_side_effects=True, vmem_limit_bytes=vmem_limit),
    )(
        tok, dec2d, k_enc, v_enc, xmask_f, astate,
        ln_w, ln_b, glu_ln1, self_w, cross_w[2:], fc0, fc1, fc2,
    )
    # TODO(synk): at the jit boundary, donate attention_state so {5:1} aliasing
    # is a true in-place update (otherwise XLA copies the whole cache per step).
    return dec_out.reshape(B, 1, E), astate_out


# ---------------------------------------------------------------------------
# pure-JAX reference (mirrors the PyTorch module literally, f32)
# ---------------------------------------------------------------------------
def _ln_ref(x, w, b, eps=1e-5):
    mu = x.mean(-1, keepdims=True)
    var = ((x - mu) ** 2).mean(-1, keepdims=True)
    return (x - mu) / jnp.sqrt(var + eps) * w + b


def _attn_ref(keys, values, queries, mask, head_count, out_w):
    B, K, E = keys.shape
    H = head_count
    D = E // H
    k = keys.reshape(B, K, H, D)
    v = values.reshape(B, K, H, D)
    q = queries.reshape(B, -1, H, D) / math.sqrt(D)
    bias = jnp.where(mask, 0.0, NEG_BIG)                           # (B, K)
    w = jnp.einsum('bqhc,bkhc->bhqk', q, k) + bias[:, None, None, :]
    w = jax.nn.softmax(w, axis=-1)
    o = jnp.einsum('bhqk,bkhc->bqhc', w, v).reshape(B, -1, E)
    return o @ out_w


def reference_forward(params, dec, enc, astate, xmask, tok, head_count):
    B = dec.shape[0]
    I = astate.shape[1]
    idx = jnp.arange(I)

    residual = dec
    h = _ln_ref(dec, params["ln_w"][0], params["ln_b"][0])
    k = h @ params["self_w"][0]
    v = h @ params["self_w"][1]
    q = h @ params["self_w"][2]
    token_mask = (idx == tok)[None, :, None]
    astate_new = jnp.where(token_mask, jnp.concatenate([k, v], axis=0), astate)
    self_mask = jnp.broadcast_to((idx < tok + 1)[None, :], (B, I))
    o = _attn_ref(astate_new[:B], astate_new[B:], q, self_mask,
                  head_count, params["self_w"][3])
    dec = residual + _ln_ref(o, params["ln_w"][1], params["ln_b"][1])

    residual = dec
    h = _ln_ref(dec, params["ln_w"][2], params["ln_b"][2])
    k = enc @ params["cross_w"][0]
    v = enc @ params["cross_w"][1]
    q = h @ params["cross_w"][2]
    o = _attn_ref(k, v, q, xmask, head_count, params["cross_w"][3])
    dec = residual + _ln_ref(o, params["ln_w"][3], params["ln_b"][3])

    residual = dec
    z = _ln_ref(dec, params["ln_w"][4], params["ln_b"][4])
    w0 = jax.nn.gelu(z @ params["glu_fc0"], approximate=False)
    v1 = z @ params["glu_fc1"]
    z = _ln_ref(w0 * v1, params["glu_ln1"][0], params["glu_ln1"][1])
    dec = residual + z @ params["glu_fc2"]
    return dec, astate_new


# ---------------------------------------------------------------------------
# main
# ---------------------------------------------------------------------------
if __name__ == "__main__":
    B = 2                 # batch
    E = 32                # embed_count
    H = 4                 # head_count
    G = 64                # glu_embed_count
    I = 16                # image_token_count
    T = 16                # encoder (text) sequence length
    TOKEN_INDEX = 5

    key = jax.random.PRNGKey(0)
    ks = jax.random.split(key, 16)

    def bf16r(x):  # bf16-representable f32 values (kernel's bf16 cast is lossless)
        return x.astype(jnp.bfloat16).astype(jnp.float32)

    params = {
        "ln_w": 1.0 + 0.02 * jax.random.normal(ks[0], (5, E), jnp.float32),
        "ln_b": 0.01 * jax.random.normal(ks[1], (5, E), jnp.float32),
        "glu_ln1": jnp.stack([
            1.0 + 0.02 * jax.random.normal(ks[2], (G,), jnp.float32),
            0.01 * jax.random.normal(ks[3], (G,), jnp.float32),
        ]),
        "self_w": bf16r(0.05 * jax.random.normal(ks[4], (4, E, E), jnp.float32)),
        "cross_w": bf16r(0.05 * jax.random.normal(ks[5], (4, E, E), jnp.float32)),
        "glu_fc0": bf16r(0.05 * jax.random.normal(ks[6], (E, G), jnp.float32)),
        "glu_fc1": bf16r(0.05 * jax.random.normal(ks[7], (E, G), jnp.float32)),
        "glu_fc2": bf16r(0.05 * jax.random.normal(ks[8], (G, E), jnp.float32)),
    }

    decoder_state = jax.random.normal(ks[9], (B, 1, E), jnp.float32)
    encoder_state = bf16r(jax.random.normal(ks[10], (B, T, E), jnp.float32))
    attention_state = bf16r(0.1 * jax.random.normal(ks[11], (2 * B, I, E),
                                                    jnp.float32))
    # per-batch valid text lengths 10 and 7
    attention_mask = jnp.arange(T)[None, :] < jnp.array([[10], [7]])

    ref_dec, ref_astate = reference_forward(
        params, decoder_state, encoder_state, attention_state,
        attention_mask, TOKEN_INDEX, H)
    ref_dec = jax.block_until_ready(ref_dec)

    dec_out, astate_out = decoder_layer_forward(
        params, decoder_state, encoder_state, attention_state,
        attention_mask, TOKEN_INDEX, H,
        wdtype=jnp.bfloat16, cache_chunk=8, glu_chunk=32)
    dec_out = jax.block_until_ready(dec_out)
    astate_out = jax.block_until_ready(astate_out)

    # bf16 memory path vs f32 reference -> bf16-level tolerance.
    np.testing.assert_allclose(np.asarray(dec_out), np.asarray(ref_dec),
                               rtol=2e-2, atol=2e-2)
    np.testing.assert_allclose(np.asarray(astate_out.astype(jnp.float32)),
                               np.asarray(ref_astate), rtol=2e-2, atol=2e-2)
    print("KERNEL_OK")
</pallas_src>

<mosaic_0001>
module attributes {stable_mosaic.version = 11 : i64} {
  func.func @cross_kv_kernel(%arg0: i32, %arg1: i32, %arg2: memref<2x16x32xbf16, #tpu.memory_space<vmem>>, %arg3: memref<32x32xbf16, #tpu.memory_space<vmem>>, %arg4: memref<32x32xbf16, #tpu.memory_space<vmem>>, %arg5: memref<2x16x32xbf16, #tpu.memory_space<vmem>>, %arg6: memref<2x16x32xbf16, #tpu.memory_space<vmem>>) attributes {dimension_semantics = [#tpu.dimension_semantics<parallel>, #tpu.dimension_semantics<parallel>], iteration_bounds = array<i64: 1, 1>, scalar_prefetch = 0 : i64, scratch_operands = 0 : i64, tpu.core_type = #tpu.core_type<tc>, window_params = [{transform_indices = @transform_0, window_bounds = array<i64: 2, 16, 32>}, {transform_indices = @transform_1, window_bounds = array<i64: 32, 32>}, {transform_indices = @transform_2, window_bounds = array<i64: 32, 32>}, {transform_indices = @transform_3, window_bounds = array<i64: 2, 16, 32>}, {transform_indices = @transform_4, window_bounds = array<i64: 2, 16, 32>}]} {
    %c0 = arith.constant 0 : index
    %c0_0 = arith.constant 0 : index
    %c0_1 = arith.constant 0 : index
    %0 = vector.load %arg2[%c0, %c0_0, %c0_1] : memref<2x16x32xbf16, #tpu.memory_space<vmem>>, vector<2x16x32xbf16>
    %1 = vector.shape_cast %0 : vector<2x16x32xbf16> to vector<32x32xbf16>
    %c0_2 = arith.constant 0 : index
    %c0_3 = arith.constant 0 : index
    %2 = vector.load %arg3[%c0_2, %c0_3] : memref<32x32xbf16, #tpu.memory_space<vmem>>, vector<32x32xbf16>
    %cst = arith.constant dense<0.000000e+00> : vector<32x32xf32>
    %3 = tpu.matmul %1, %2, %cst {dimension_numbers = #tpu.dot_dimension_numbers<[1], [0], [0], [1], [0, 0, 1, 1], [], []>} : vector<32x32xbf16>, vector<32x32xbf16>, vector<32x32xf32> -> vector<32x32xf32>
    %c0_4 = arith.constant 0 : index
    %c0_5 = arith.constant 0 : index
    %4 = vector.load %arg4[%c0_4, %c0_5] : memref<32x32xbf16, #tpu.memory_space<vmem>>, vector<32x32xbf16>
    %cst_6 = arith.constant dense<0.000000e+00> : vector<32x32xf32>
    %5 = tpu.matmul %1, %4, %cst_6 {dimension_numbers = #tpu.dot_dimension_numbers<[1], [0], [0], [1], [0, 0, 1, 1], [], []>} : vector<32x32xbf16>, vector<32x32xbf16>, vector<32x32xf32> -> vector<32x32xf32>
    %6 = vector.shape_cast %3 : vector<32x32xf32> to vector<2x16x32xf32>
    %7 = arith.truncf %6 : vector<2x16x32xf32> to vector<2x16x32xbf16>
    %c0_7 = arith.constant 0 : index
    %c0_8 = arith.constant 0 : index
    %c0_9 = arith.constant 0 : index
    %8 = vector.load %arg5[%c0_7, %c0_8, %c0_9] : memref<2x16x32xbf16, #tpu.memory_space<vmem>>, vector<2x16x32xbf16>
    tpu.vector_store %arg5[%c0_7, %c0_8, %c0_9], %7 {strides = array<i32>} : memref<2x16x32xbf16, #tpu.memory_space<vmem>>, vector<2x16x32xbf16>,
    %9 = vector.shape_cast %5 : vector<32x32xf32> to vector<2x16x32xf32>
    %10 = arith.truncf %9 : vector<2x16x32xf32> to vector<2x16x32xbf16>
    %c0_10 = arith.constant 0 : index
    %c0_11 = arith.constant 0 : index
    %c0_12 = arith.constant 0 : index
    %11 = vector.load %arg6[%c0_10, %c0_11, %c0_12] : memref<2x16x32xbf16, #tpu.memory_space<vmem>>, vector<2x16x32xbf16>
    tpu.vector_store %arg6[%c0_10, %c0_11, %c0_12], %10 {strides = array<i32>} : memref<2x16x32xbf16, #tpu.memory_space<vmem>>, vector<2x16x32xbf16>,
    return
  }
  func.func @transform_0(%arg0: i32, %arg1: i32) -> (i32, i32, i32) {
    %c0_i32 = arith.constant 0 : i32
    %c0_i32_0 = arith.constant 0 : i32
    %c0_i32_1 = arith.constant 0 : i32
    return %c0_i32, %arg0, %c0_i32_0 : i32, i32, i32
  }
  func.func @transform_1(%arg0: i32, %arg1: i32) -> (i32, i32) {
    %c0_i32 = arith.constant 0 : i32
    %c0_i32_0 = arith.constant 0 : i32
    return %c0_i32, %arg1 : i32, i32
  }
  func.func @transform_2(%arg0: i32, %arg1: i32) -> (i32, i32) {
    %c0_i32 = arith.constant 0 : i32
    %c0_i32_0 = arith.constant 0 : i32
    return %c0_i32, %arg1 : i32, i32
  }
  func.func @transform_3(%arg0: i32, %arg1: i32) -> (i32, i32, i32) {
    %c0_i32 = arith.constant 0 : i32
    %c0_i32_0 = arith.constant 0 : i32
    return %c0_i32, %arg0, %arg1 : i32, i32, i32
  }
  func.func @transform_4(%arg0: i32, %arg1: i32) -> (i32, i32, i32) {
    %c0_i32 = arith.constant 0 : i32
    %c0_i32_0 = arith.constant 0 : i32
    return %c0_i32, %arg0, %arg1 : i32, i32, i32
  }
}

</mosaic_0001>

<bundles_post_ra>
// kernel: tpu_custom_call.1
= control target key start
LH: loop header
LB: loop body
LE: loop exit
PB: predicated region body
PF: predicated region fallthrough
CT: control target
= control target key end

     0   :  { %10 = vsyncpa [#allocation3], 0  ;;  %s527_s0 = inlined_call_operand.hbm [shape: bf16[2,16,32], index: 0, kind: input, shape index: {}]   ;;  %s528_s1 = inlined_call_operand.hbm [shape: bf16[32,32], index: 1, kind: input, shape index: {}]   ;;  %s529_s2 = inlined_call_operand.hbm [shape: bf16[32,32], index: 2, kind: input, shape index: {}]   ;;  %s530_s3 = inlined_call_operand.hbm [shape: bf16[2,16,32], index: 3, kind: output, shape index: {0}]   ;;  %s531_s4 = inlined_call_operand.hbm [shape: bf16[2,16,32], index: 4, kind: output, shape index: {1}]  }
   0x1   :  { %11 = vsyncpa [#allocation6], 0 }
   0x2   :  { %12 = vsyncpa [#allocation4], 0 }
   0x3   :  { %13 = vsyncpa [#allocation10], 0  ;;  %s457_s15 = smov [#allocation5]   ;;  %s458_s17 = smov [#allocation2]  }
   0x4   :  { %s31_s16 = sshll.u32 %s457_s15, 4  ;;  %s19_s18 = sshll.u32 %s458_s17, 4  ;;  %s32_s16 = int_to_ptr.vmem [resolvable:$true] %s31_s16  ;;  %s20_s18 = int_to_ptr.vmem [resolvable:$true] %s19_s18 }
   0x5   :  { %s357_s19 = scalar_lea.vmem %s32_s16, 256  ;;  %p362_p1 = scmp.lt.s32.totalorder %s32_s16, %s32_s16 }
   0x6   :  { %p358_p0 = scmp.ne.s32.totalorder %s32_s16, %s357_s19  ;;  %p363_p2 = scmp.lt.s32.totalorder %s357_s19, %s357_s19 }
   0x8   :  { %p364_p3 = por %p363_p2, %p362_p1 }
   0xa   :  { %p365_p4 = pnand %p364_p3, %p358_p0 }
   0xc   :  { %368 = shalt.err (!%p365_p4)
}
   0xd   :  { %s459_s20 = smov 64   ;;  %s460_s21 = smov 4  }
   0xe   :  { %37 = dma.hbm_to_vmem [thread:$0]  %s528_s1, 256, %s32_s16, [#allocation6], %s459_s20, %s459_s20, %s460_s21  }
   0xf   :  { %s377_s24 = scalar_lea.vmem %s20_s18, 256  ;;  %p382_p6 = scmp.lt.s32.totalorder %s20_s18, %s20_s18 }
  0x10   :  { %p378_p5 = scmp.ne.s32.totalorder %s20_s18, %s377_s24  ;;  %p383_p7 = scmp.lt.s32.totalorder %s377_s24, %s377_s24 }
  0x12   :  { %p384_p8 = por %p383_p7, %p382_p6 }
  0x14   :  { %p385_p9 = pnand %p384_p8, %p378_p5 }
  0x16   :  { %388 = shalt.err (!%p385_p9)
}
  0x17   :  { %25 = dma.hbm_to_vmem [thread:$0]  %s527_s0, 256, %s20_s18, [#allocation3], %s459_s20, %s459_s20, %s460_s21  }
  0x18   :  { %s461_s27 = smov [#allocation7]  }
  0x19   :  { %s43_s28 = sshll.u32 %s461_s27, 4  ;;  %s44_s28 = int_to_ptr.vmem [resolvable:$true] %s43_s28 }
  0x1a   :  { %s397_s29 = scalar_lea.vmem %s44_s28, 256  ;;  %p402_p11 = scmp.lt.s32.totalorder %s44_s28, %s44_s28 }
  0x1b   :  { %p398_p10 = scmp.ne.s32.totalorder %s44_s28, %s397_s29  ;;  %p403_p12 = scmp.lt.s32.totalorder %s397_s29, %s397_s29 }
  0x1d   :  { %p404_p13 = por %p403_p12, %p402_p11 }
  0x1f   :  { %p405_p0 = pnand %p404_p13, %p398_p10 }
  0x21   :  { %408 = shalt.err (!%p405_p0)
}
  0x22   :  { %49 = dma.hbm_to_vmem [thread:$0]  %s529_s2, 256, %s44_s28, [#allocation6], %s459_s20, %s459_s20, %s460_s21  }
  0x23   :  { %449 = dma.done.wait [#allocation3], 256  }
  0x24   :  { %450 = vsyncadd [#allocation3], 4294967040 }
  0x25   :  { %451 = dma.done.wait [#allocation6], 512  }
  0x26   :  { %452 = vsyncadd [#allocation6], 4294966784  ;;  %v343_v0 = vld [vmem:[#allocation5 + $0x8] sm:$0xff]   ;;  %v344_v1 = vld [vmem:[#allocation7 + $0x8] sm:$0xff]   ;;  %vm90_vm0 = vcmask 261120   ;;  %vm227_vm1 = vcmask 257024  }
  0x27   :  { %320 = vmatprep.subr.bf16.mxu0 %v343_v0  ;;  %v345_v2 = vld [vmem:[#allocation5] sm:$0xff]   ;;  %328 = vmatprep.subr.bf16.mxu1 %v344_v1  ;;  %v346_v3 = vld [vmem:[#allocation7] sm:$0xff]   ;;  %v348_v5 = vld [vmem:[#allocation2 + $0x8] sm:$0xff]   ;;  %s462_s0 = smov [#allocation8]   ;;  %s463_s5 = smov [#allocation9]  }
  0x28   :  { %321 = vmatpush3.bf16.msra.mxu0 %v343_v0  ;;  %329 = vmatpush3.bf16.msra.mxu1 %v344_v1  ;;  %v347_v4 = vld [vmem:[#allocation2] sm:$0xff]   ;;  %s257_s2 = sshll.u32 %s462_s0, 4  ;;  %s269_s6 = sshll.u32 %s463_s5, 4  ;;  %s258_s2 = int_to_ptr.vmem [resolvable:$true] %s257_s2  ;;  %s270_s6 = int_to_ptr.vmem [resolvable:$true] %s269_s6 }
  0x29   :  { %322 = vmatprep.subr.bf16.mxu0 %v345_v2  ;;  %330 = vmatprep.subr.bf16.mxu1 %v346_v3  ;;  %s409_s7 = scalar_lea.vmem %s258_s2, 256  ;;  %p414_p2 = scmp.lt.s32.totalorder %s258_s2, %s258_s2 }
  0x2a   :  { %324 = vmatprep.mubr.msk.bf16.mxu0 %vm90_vm0, %v347_v4  ;;  %332 = vmatprep.mubr.msk.bf16.mxu1 %vm90_vm0, %v347_v4  ;;  %p410_p1 = scmp.ne.s32.totalorder %s258_s2, %s409_s7  ;;  %p415_p3 = scmp.lt.s32.totalorder %s409_s7, %s409_s7 }
  0x2c   :  { %323 = vmatpush3.bf16.msra.mxu0 %v345_v2  ;;  %331 = vmatpush3.bf16.msra.mxu1 %v346_v3  ;;  %p416_p4 = por %p415_p3, %p414_p2 }
  0x2e   :  { %p417_p5 = pnand %p416_p4, %p410_p1 }
  0x2f   :  { %325 = vmatmul.mubr.msk.bf16.vlgmr.msra.gmra.mxu0 %vm90_vm0, %v348_v5  ;;  %333 = vmatmul.mubr.msk.bf16.vlgmr.msra.gmra.mxu1 %vm90_vm0, %v348_v5 }
  0xef   :  { %v326_v6 = vpop.f32.mrf.mxu0  ;;  %v334_v8 = vpop.f32.mrf.mxu1 }
  0xf0   :  { %v306_v7 = vpack.c.bf16 %v326_v6, %v326_v6  ;;  %v310_v9 = vpack.c.bf16 %v334_v8, %v334_v8 }
  0xf1   :  { %v131_v10 = vpop.f32.mrf.mxu0  ;;  %v196_v12 = vpop.f32.mrf.mxu1 }
  0xf2   :  { %230 = vst.msk [vmem:[#allocation8 + $0x8] sm:$0xf] %vm227_vm1, %v306_v7  ;;  %v304_v11 = vpack.c.bf16 %v131_v10, %v131_v10  ;;  %250 = vst.msk [vmem:[#allocation9 + $0x8] sm:$0xf] %vm227_vm1, %v310_v9  ;;  %v308_v13 = vpack.c.bf16 %v196_v12, %v196_v12 }
  0xf3   :  { %v327_v14 = vpop.f32.mrf.mxu0  ;;  %v335_v16 = vpop.f32.mrf.mxu1 }
  0xf4   :  { %228 = vst.msk [vmem:[#allocation8] sm:$0xf] %vm227_vm1, %v304_v11  ;;  %v307_v15 = vpack.c.bf16 %v327_v14, %v327_v14  ;;  %248 = vst.msk [vmem:[#allocation9] sm:$0xf] %vm227_vm1, %v308_v13  ;;  %v311_v17 = vpack.c.bf16 %v335_v16, %v335_v16 }
  0xf5   :  { %v134_v18 = vpop.f32.mrf.mxu0  ;;  %v199_v20 = vpop.f32.mrf.mxu1 }
  0xf6   :  { %231 = vst.msk [vmem:[#allocation8 + $0xc] sm:$0xf] %vm227_vm1, %v307_v15  ;;  %v305_v19 = vpack.c.bf16 %v134_v18, %v134_v18  ;;  %251 = vst.msk [vmem:[#allocation9 + $0xc] sm:$0xf] %vm227_vm1, %v311_v17  ;;  %v309_v21 = vpack.c.bf16 %v199_v20, %v199_v20 }
  0xf8   :  { %229 = vst.msk [vmem:[#allocation8 + $0x4] sm:$0xf] %vm227_vm1, %v305_v19  ;;  %249 = vst.msk [vmem:[#allocation9 + $0x4] sm:$0xf] %vm227_vm1, %v309_v21 }
  0xf9   :  { %420 = shalt.err (!%p417_p5)
}
  0xfa   :  { %263 = dma.vmem_to_hbm [thread:$0]  %s258_s2, 256, %s530_s3, [#allocation4], %s459_s20, %s459_s20, %s460_s21  }
  0xfb   :  { %s429_s10 = scalar_lea.vmem %s270_s6, 256  ;;  %p434_p7 = scmp.lt.s32.totalorder %s270_s6, %s270_s6 }
  0xfc   :  { %p430_p6 = scmp.ne.s32.totalorder %s270_s6, %s429_s10  ;;  %p435_p8 = scmp.lt.s32.totalorder %s429_s10, %s429_s10 }
  0xfe   :  { %p436_p9 = por %p435_p8, %p434_p7 }
 0x100   :  { %p437_p10 = pnand %p436_p9, %p430_p6 }
 0x102   :  { %440 = shalt.err (!%p437_p10)
}
 0x103   :  { %275 = dma.vmem_to_hbm [thread:$0]  %s270_s6, 256, %s531_s4, [#allocation10], %s459_s20, %s459_s20, %s460_s21  }
 0x104   :  { %453 = dma.done.wait [#allocation4], 256  }
 0x105   :  { %454 = vsyncadd [#allocation4], 4294967040 }
 0x106   :  { %455 = dma.done.wait [#allocation10], 256  }
 0x107   :  { %456 = vsyncadd [#allocation10], 4294967040 }
 0x108   :  { %282 = vsyncpa [#allocation3], 1 }
 0x109   :  { %283 = vsyncpa [#allocation6], 1 }
 0x10a   :  { %284 = vsyncpa [#allocation4], 1 }
 0x10b   :  { %285 = vsyncpa [#allocation10], 1 }

</bundles_post_ra>
